<compile_context>
chip_gen: v6e
topology: v6e:2x2x1
jax: 0.10.0
libtpu: 0.0.40
codegen_flags: <defaults>
</compile_context>

<pallas_src>
import functools

import jax
import jax.numpy as jnp
from jax import lax
from jax.experimental import pallas as pl
from jax.experimental.pallas import tpu as pltpu

LANES = 128  # vreg lane width


def _soft_hist_kernel(x_ref, out_ref, *, num_bins):
    # x_ref:   (tile_rows, 128 // num_bins) — one feature value per element,
    #          the features covered by this tile of output rows.
    # out_ref: (tile_rows, 128) lane-dense tile of the flattened (F*B,) result
    #          (feature-major / bin-minor).
    lanes = out_ref.shape[-1]                    # 128
    fpb = lanes // num_bins                      # features per output row
    shift = num_bins.bit_length() - 1            # num_bins is a power of two here

    # One-hot lane-replication matrix R[j, l] = 1.0 iff l // B == j.
    lane = lax.broadcasted_iota(jnp.int32, (fpb, lanes), 1)
    feat = lax.broadcasted_iota(jnp.int32, (fpb, lanes), 0)
    rep = ((lane >> shift) == feat).astype(jnp.float32)

    # Row-invariant bin centers: flat % B == lane % B because 128 % B == 0.
    lane_row = lax.broadcasted_iota(jnp.int32, (1, lanes), 1)
    bin_idx = (lane_row & (num_bins - 1)).astype(jnp.float32)
    centers = -(bin_idx + 0.5) * (1.0 / num_bins)            # (1, 128)

    # Replicate each feature across its B bins on the otherwise-idle MXU.
    x_rep = jnp.dot(x_ref[...], rep, preferred_element_type=jnp.float32)

    voted = (-2.0 * num_bins) * jnp.abs(x_rep + centers) + 1.0   # widths conv
    out_ref[...] = jnp.maximum(voted, 0.0)                       # relu


def _choose_tile_rows(rows):
    """Pick the output-tile height (rows of 128 lanes).

    Prefer: (a) tiles that divide `rows` exactly (no padding -> no output-slice
    copy), (b) >= 2 grid steps when there is enough work (v7x megacore),
    (c) tiles up to 2048 rows (1 MiB f32/block) to amortize per-step overhead.
    """
    max_rows = 2048
    if rows < 16:
        return rows                       # single block == full array extent
    if rows % 8 != 0:
        if rows <= max_rows:
            return rows                   # single block; avoids pad + slice
        return max_rows                   # huge awkward size: tile, accept slice
    # rows is a multiple of 8 and >= 16: split into >= 2 tiles.
    t = min(max_rows, max(8, (rows // 2) // 8 * 8))
    while t > 8 and rows % t != 0:        # prefer an exact divisor (no padding)
        t -= 8
    return t


def _soft_histogram_pallas(x, n_features, num_bins):
    F, B = n_features, num_bins
    total = F * B
    fpb = LANES // B                              # features per output row

    rows = pl.cdiv(F, fpb)
    tile_rows = _choose_tile_rows(rows)
    grid = pl.cdiv(rows, tile_rows)
    rows_pad = grid * tile_rows
    f_pad = rows_pad * fpb

    x_in = x if f_pad == F else jnp.pad(x, (0, f_pad - F))   # F-scale pad only
    x2 = x_in.reshape(rows_pad, fpb)                          # free reshape

    kernel = functools.partial(_soft_hist_kernel, num_bins=B)
    out2d = pl.pallas_call(
        kernel,
        out_shape=jax.ShapeDtypeStruct((rows_pad, LANES), jnp.float32),
        grid=(grid,),
        in_specs=[pl.BlockSpec((tile_rows, fpb), lambda r: (r, 0))],
        out_specs=pl.BlockSpec((tile_rows, LANES), lambda r: (r, 0)),
        compiler_params=pltpu.CompilerParams(
            dimension_semantics=("parallel",)),
    )(x2)

    if rows_pad * LANES == total:
        return out2d.reshape(-1)          # metadata-only reshape, no copy
    return out2d.reshape(-1)[:total]      # only awkward F pays the slice copy


def _soft_histogram_jax(x, n_features, num_bins):
    """Fused plain-XLA path (small problems / B not dividing 128)."""
    F, B = n_features, num_bins
    centers = -1.0 / B * (jnp.arange(B, dtype=jnp.float32) + 0.5)
    y = jnp.abs(x.reshape(F, 1) + centers[None, :])
    y = jnp.maximum((-2.0 * B) * y + 1.0, 0.0)
    return y.reshape(-1)


def soft_histogram(x, n_features, num_bins, quantiles=False, *,
                   min_pallas_elems=1 << 16):
    """Pallas-backed SoftHistogram.forward.  x: (n_features,) float."""
    F, B = int(n_features), int(num_bins)
    x = x.astype(jnp.float32)
    total = F * B

    use_pallas = (B >= 1) and (LANES % B == 0) and (total >= min_pallas_elems)
    if use_pallas:
        out_flat = _soft_histogram_pallas(x, F, B)
    else:
        out_flat = _soft_histogram_jax(x, F, B)

    if quantiles:
        # torch: input.view(-1, num_bins).cumsum(dim=1) — glue, not hot path.
        # TODO(synk): quantiles branch kept in plain JAX; verify against the
        # PyTorch quantile variant if it is ever exercised.
        out_flat = jnp.cumsum(out_flat.reshape(-1, B), axis=1).reshape(-1)

    return out_flat


def soft_histogram_ref(x, n_features, num_bins):
    """Pure-JAX reference for correctness checking."""
    return _soft_histogram_jax(x.astype(jnp.float32), n_features, num_bins)


if __name__ == "__main__":
    n_features = 32
    num_bins = 8
    n_examples = 16  # unused in forward (hist_pool is never applied)

    key = jax.random.PRNGKey(0)
    k_small, k_large = jax.random.split(key)

    # Small default shape: force the Pallas path so the kernel itself runs.
    x = jax.random.uniform(k_small, (n_features,), dtype=jnp.float32)
    out = soft_histogram(x, n_features, num_bins, min_pallas_elems=0)
    out = jax.block_until_ready(out)
    ref = soft_histogram_ref(x, n_features, num_bins)
    assert out.shape == (n_features * num_bins,)
    assert jnp.allclose(out, ref, atol=1e-5, rtol=1e-5)

    # Larger shape: exercises the multi-step tiled grid (2 parallel steps).
    F2, B2 = 8192, 8
    x2 = jax.random.uniform(k_large, (F2,), dtype=jnp.float32)
    out2 = jax.block_until_ready(
        soft_histogram(x2, F2, B2, min_pallas_elems=0))
    ref2 = soft_histogram_ref(x2, F2, B2)
    assert out2.shape == (F2 * B2,)
    assert jnp.allclose(out2, ref2, atol=1e-5, rtol=1e-5)

    print("KERNEL_OK")
</pallas_src>

<mosaic_0001>
module attributes {stable_mosaic.version = 11 : i64} {
  func.func @_soft_hist_kernel(%arg0: i32, %arg1: memref<2x16xf32, #tpu.memory_space<vmem>>, %arg2: memref<2x128xf32, #tpu.memory_space<vmem>>) attributes {dimension_semantics = [#tpu.dimension_semantics<parallel>], iteration_bounds = array<i64: 1>, scalar_prefetch = 0 : i64, scratch_operands = 0 : i64, tpu.core_type = #tpu.core_type<tc>, window_params = [{transform_indices = @transform_0, window_bounds = array<i64: 2, 16>}, {transform_indices = @transform_1, window_bounds = array<i64: 2, 128>}]} {
    %0 = tpu.iota {dimensions = array<i32: 1>} : vector<16x128xi32>
    %1 = tpu.iota {dimensions = array<i32: 0>} : vector<16x128xi32>
    %c3_i32 = arith.constant 3 : i32
    %2 = vector.broadcast %c3_i32 : i32 to vector<16x128xi32>
    %3 = arith.shrsi %0, %2 : vector<16x128xi32>
    %4 = arith.cmpi eq, %3, %1 : vector<16x128xi32>
    %5 = arith.extui %4 : vector<16x128xi1> to vector<16x128xi32>
    %6 = arith.sitofp %5 : vector<16x128xi32> to vector<16x128xf32>
    %7 = tpu.iota {dimensions = array<i32: 1>} : vector<1x128xi32>
    %c7_i32 = arith.constant 7 : i32
    %8 = vector.broadcast %c7_i32 : i32 to vector<1x128xi32>
    %9 = arith.andi %7, %8 : vector<1x128xi32>
    %10 = arith.sitofp %9 : vector<1x128xi32> to vector<1x128xf32>
    %cst = arith.constant 5.000000e-01 : f32
    %11 = vector.broadcast %cst : f32 to vector<1x128xf32>
    %12 = arith.addf %10, %11 : vector<1x128xf32>
    %cst_0 = arith.constant 0.000000e+00 : f32
    %13 = vector.broadcast %cst_0 : f32 to vector<1x128xf32>
    %14 = arith.subf %13, %12 : vector<1x128xf32>
    %cst_1 = arith.constant 1.250000e-01 : f32
    %15 = vector.broadcast %cst_1 : f32 to vector<1x128xf32>
    %16 = arith.mulf %14, %15 : vector<1x128xf32>
    %c0 = arith.constant 0 : index
    %c0_2 = arith.constant 0 : index
    %17 = vector.load %arg1[%c0, %c0_2] : memref<2x16xf32, #tpu.memory_space<vmem>>, vector<2x16xf32>
    %cst_3 = arith.constant dense<0.000000e+00> : vector<2x128xf32>
    %18 = tpu.matmul %17, %6, %cst_3 {dimension_numbers = #tpu.dot_dimension_numbers<[1], [0], [0], [1], [0, 0, 1, 1], [], []>} : vector<2x16xf32>, vector<16x128xf32>, vector<2x128xf32> -> vector<2x128xf32>
    %19 = vector.broadcast %16 : vector<1x128xf32> to vector<2x128xf32>
    %20 = arith.addf %18, %19 : vector<2x128xf32>
    %21 = math.absf %20 : vector<2x128xf32>
    %cst_4 = arith.constant -1.600000e+01 : f32
    %22 = vector.broadcast %cst_4 : f32 to vector<2x128xf32>
    %23 = arith.mulf %22, %21 : vector<2x128xf32>
    %cst_5 = arith.constant 1.000000e+00 : f32
    %24 = vector.broadcast %cst_5 : f32 to vector<2x128xf32>
    %25 = arith.addf %23, %24 : vector<2x128xf32>
    %cst_6 = arith.constant 0.000000e+00 : f32
    %26 = vector.broadcast %cst_6 : f32 to vector<2x128xf32>
    %27 = arith.maximumf %25, %26 : vector<2x128xf32>
    %c0_7 = arith.constant 0 : index
    %c0_8 = arith.constant 0 : index
    %28 = vector.load %arg2[%c0_7, %c0_8] : memref<2x128xf32, #tpu.memory_space<vmem>>, vector<2x128xf32>
    tpu.vector_store %arg2[%c0_7, %c0_8], %27 {strides = array<i32>} : memref<2x128xf32, #tpu.memory_space<vmem>>, vector<2x128xf32>,
    return
  }
  func.func @transform_0(%arg0: i32) -> (i32, i32) {
    %c0_i32 = arith.constant 0 : i32
    %c0_i32_0 = arith.constant 0 : i32
    return %arg0, %c0_i32 : i32, i32
  }
  func.func @transform_1(%arg0: i32) -> (i32, i32) {
    %c0_i32 = arith.constant 0 : i32
    %c0_i32_0 = arith.constant 0 : i32
    return %arg0, %c0_i32 : i32, i32
  }
}

</mosaic_0001>

<bundles_post_ra>
// kernel: tpu_custom_call.1
= control target key start
LH: loop header
LB: loop body
LE: loop exit
PB: predicated region body
PF: predicated region fallthrough
CT: control target
= control target key end

     0   :  { %6 = vsyncpa [#allocation3], 0  ;;  %s218_s0 = inlined_call_operand.hbm [shape: f32[2,16], index: 0, kind: input, shape index: {}]   ;;  %s219_s1 = inlined_call_operand.hbm [shape: f32[2,128], index: 1, kind: output, shape index: {}]  }
   0x1   :  { %7 = vsyncpa [#allocation4], 0  ;;  %s197_s6 = smov [#allocation2]  }
   0x2   :  { %s14_s7 = sshll.u32 %s197_s6, 4  ;;  %s15_s7 = int_to_ptr.vmem [resolvable:$true] %s14_s7 }
   0x3   :  { %s161_s8 = scalar_lea.vmem %s15_s7, 32  ;;  %p166_p1 = scmp.lt.s32.totalorder %s15_s7, %s15_s7 }
   0x4   :  { %p162_p0 = scmp.ne.s32.totalorder %s15_s7, %s161_s8  ;;  %p167_p2 = scmp.lt.s32.totalorder %s161_s8, %s161_s8 }
   0x6   :  { %p168_p3 = por %p167_p2, %p166_p1 }
   0x8   :  { %p169_p4 = pnand %p168_p3, %p162_p0 }
   0xa   :  { %172 = shalt.err (!%p169_p4)
}
   0xb   :  { %17 = dma.hbm_to_vmem [thread:$0]  %s218_s0, 32, %s15_s7, [#allocation3]  }
   0xc   :  { %193 = dma.done.wait [#allocation3], 32  }
   0xd   :  { %194 = vsyncadd [#allocation3], 4294967264  ;;  %v21_v0 = vlaneseq  ;;  %v198_v1 = vmov 0.0   ;;  %vm199_vm0 = vmmov 0   ;;  %v200_v6 = vmov 1.0   ;;  %s201_s0 = smov [#allocation5]  }
   0xe   :  { %141 = vmatprep.subr.mxu0 %v198_v1  ;;  %145 = vmatprep.mubr.msk.f32.mxu0 %vm199_vm0, %v198_v1  ;;  %v38_v7 = vld [vmem:[#allocation2] sm:$0x3]  ;;  %vm39_vm3 = vcmask 130048   ;;  %s124_s11 = sshll.u32 %s201_s0, 4  ;;  %s125_s11 = int_to_ptr.vmem [resolvable:$true] %s124_s11 }
   0xf   :  { %v22_v2 = vand.u32 127, %v21_v0  ;;  %v24_v3 = vshrl.u32 %v21_v0, 7  ;;  %s173_s12 = scalar_lea.vmem %s125_s11, 32  ;;  %p178_p6 = scmp.lt.s32.totalorder %s125_s11, %s125_s11 }
  0x10   :  { %p174_p5 = scmp.ne.s32.totalorder %s125_s11, %s173_s12  ;;  %p179_p7 = scmp.lt.s32.totalorder %s173_s12, %s173_s12 }
  0x11   :  { %v25_v4 = vadd.s32 8, %v24_v3  ;;  %v26_v5 = vshra.s32 %v22_v2, 3  ;;  %v33_v8 = vand.u32 7, %v22_v2 }
  0x12   :  { %p180_p8 = por %p179_p7, %p178_p6 }
  0x13   :  { %vm28_vm1 = vcmp.eq.s32.totalorder %v26_v5, %v25_v4  ;;  %vm27_vm2 = vcmp.eq.s32.totalorder %v26_v5, %v24_v3  ;;  %v34_v9 = vcvt.s32.f32 %v33_v8 }
  0x14   :  { %142 = vmatpush3.msk.msra.mxu0 %vm28_vm1, %v200_v6  ;;  %p181_p9 = pnand %p180_p8, %p174_p5 }
  0x15   :  { %143 = vmatprep.subr.mxu0 %v198_v1  ;;  %v35_v10 = vadd.f32 0.5, %v34_v9 }
  0x16   :  { %144 = vmatpush3.msk.msra.mxu0 %vm27_vm2, %v200_v6 }
  0x17   :  { %146 = vmatmul.mubr.msk.f32.vlgmr.msra.gmra.mxu0 %vm39_vm3, %v38_v7  ;;  %v36_v11 = vsub.f32 0.0, %v35_v10 }
  0x19   :  { %v37_v12 = vmul.f32 0.125, %v36_v11 }
  0xd7   :  { %v109_v13 = vpop.f32.mrf.mxu0 }
  0xd8   :  { %v110_v14 = vadd.f32 %v109_v13, %v37_v12 }
  0xd9   :  { %v147_v15 = vpop.f32.mrf.mxu0 }
  0xda   :  { %v113_v16 = vand.u32 2147483647, %v110_v14 }
  0xdc   :  { %v114_v17 = vmul.f32 -16.0, %v113_v16 }
  0xde   :  { %v115_v18 = vadd.f32 1.0, %v114_v17 }
  0xe0   :  { %v116_v19 = vmax.f32 %v115_v18, 0.0 }
  0xe2   :  { %117 = vst [vmem:[#allocation5] sm:$0x3] %v116_v19 }
  0xe3   :  { %184 = shalt.err (!%p181_p9)
}
  0xe4   :  { %127 = dma.vmem_to_hbm [thread:$0]  %s125_s11, 32, %s219_s1, [#allocation4]  }
  0xe5   :  { %195 = dma.done.wait [#allocation4], 32  }
  0xe6   :  { %196 = vsyncadd [#allocation4], 4294967264 }
  0xe7   :  { %131 = vsyncpa [#allocation3], 1 }
  0xe8   :  { %132 = vsyncpa [#allocation4], 1 }

</bundles_post_ra>
